<compile_context>
chip_gen: v7x
topology: tpu7x:2x2x1
jax: 0.10.0
libtpu: 0.0.40
codegen_flags: <defaults>
</compile_context>

<pallas_src>
import functools

import jax
import jax.numpy as jnp
from jax.experimental import pallas as pl
from jax.experimental.pallas import tpu as pltpu


def _cdiv(a, b):
    return -(-a // b)


def _round_up(x, m):
    return ((x + m - 1) // m) * m


def _phi_z_kernel(z_ref, wt_ref, b_ref, o_ref, *, compute_dtype):
    # z_ref : (tm, z_dim)   activation rows (K whole per step -> no reduction axis)
    # wt_ref: (z_dim, tn)   pre-transposed weight tile (canonical (M,K)@(K,N))
    # b_ref : (1, tn)       f32 bias tile
    # o_ref : (tm, tn)      output tile
    z = z_ref[...]
    if z.dtype != compute_dtype:
        z = z.astype(compute_dtype)  # feed the MXU at its native rate (bf16 opt-in)
    acc = jnp.dot(z, wt_ref[...], preferred_element_type=jnp.float32)
    acc = acc + b_ref[...]           # f32 epilogue on the VPU (v5e-safe)
    o_ref[...] = jnp.maximum(acc, 0.0).astype(o_ref.dtype)


def phi_z_forward(z, weight, bias, *, tm_max=1024, tn_max=512, compute_dtype=None):
    """y = relu(z @ weight.T + bias).

    z:      (..., z_dim)
    weight: (h_dim, z_dim)   PyTorch nn.Linear layout
    bias:   (h_dim,)
    compute_dtype: dtype fed to the MXU (e.g. jnp.bfloat16); accumulation is
                   always f32.  Defaults to z.dtype.
    returns (..., h_dim) in z.dtype
    """
    orig_lead = z.shape[:-1]
    z_dim = z.shape[-1]
    h_dim = weight.shape[0]
    assert weight.shape == (h_dim, z_dim)
    assert bias.shape == (h_dim,)

    z2d = z.reshape(-1, z_dim)       # flatten leading dims into one big GEMM
    M = z2d.shape[0]

    compute_dtype = jnp.dtype(z2d.dtype if compute_dtype is None else compute_dtype)

    # One-time tiny transform of the (reused) weight: (out,in) -> (in,out),
    # cast once to the compute dtype.  Bias stays f32 for the epilogue.
    wt = weight.T.astype(compute_dtype)               # (z_dim, h_dim)
    b2d = bias.reshape(1, h_dim).astype(jnp.float32)  # (1, h_dim)

    # ---- tile selection (no padding; boundaries masked by the cdiv grid) ----
    # N tile: whole h_dim when it fits (block dim == full dim is always legal),
    # otherwise a 128-multiple so the masked boundary block stays legal.
    if h_dim <= tn_max:
        tn = h_dim
    else:
        tn = max(128, (tn_max // 128) * 128)

    # M tile: large tiles amortize per-step overhead; keep >=2 row blocks when
    # M allows (v7x has 2 TCs) and balance stripes so the tail stays ~full.
    g_min = 2 if M > 8 else 1
    g = max(g_min, _cdiv(M, tm_max))
    tm = min(tm_max, _round_up(_cdiv(M, g), 8))

    # VMEM guard: double-buffered per-step bytes must stay well under the
    # tightest budget (v7x: 64 MiB physical, 32 MiB default scoped).
    def _footprint(tm_, tn_):
        in_b = 2 * (tm_ * z_dim * z2d.dtype.itemsize
                    + z_dim * tn_ * compute_dtype.itemsize
                    + tn_ * 4)
        out_b = 2 * tm_ * tn_ * z2d.dtype.itemsize
        return in_b + out_b

    VMEM_BUDGET = 20 * 1024 * 1024
    while _footprint(tm, tn) > VMEM_BUDGET and tm > 8:
        tm = max(8, _round_up(tm // 2, 8))

    grid = (_cdiv(M, tm), _cdiv(h_dim, tn))

    kernel = functools.partial(_phi_z_kernel, compute_dtype=compute_dtype)

    out = pl.pallas_call(
        kernel,
        out_shape=jax.ShapeDtypeStruct((M, h_dim), z.dtype),
        grid_spec=pl.GridSpec(
            grid=grid,
            in_specs=[
                # z row stream: K whole and un-padded (last dim == full dim).
                pl.BlockSpec((tm, z_dim), lambda i, j: (i, 0)),
                # Weight/bias depend only on j: with a single N block they are
                # grid-invariant, so Pallas never re-DMAs them across M tiles.
                pl.BlockSpec((z_dim, tn), lambda i, j: (0, j)),
                pl.BlockSpec((1, tn), lambda i, j: (0, j)),
            ],
            out_specs=pl.BlockSpec((tm, tn), lambda i, j: (i, j)),
        ),
        compiler_params=pltpu.CompilerParams(
            dimension_semantics=("parallel", "parallel"),
            vmem_limit_bytes=40 * 1024 * 1024,  # > v5e's 16 MiB default, < v7x's 64 MiB physical
        ),
    )(z2d, wt, b2d)

    return out.reshape(*orig_lead, h_dim)


def _reference(z, weight, bias):
    return jnp.maximum(z @ weight.T + bias, 0.0)


if __name__ == "__main__":
    key = jax.random.PRNGKey(0)
    kz, kw, kb = jax.random.split(key, 3)

    # Shapes consistent with the module: batch=8, z_dim=16, h_dim=32.
    B, z_dim, h_dim = 8, 16, 32
    bound = 1.0 / (z_dim ** 0.5)
    z = jax.random.normal(kz, (B, z_dim), dtype=jnp.float32)
    weight = jax.random.uniform(kw, (h_dim, z_dim), minval=-bound, maxval=bound,
                                dtype=jnp.float32)
    bias = jax.random.uniform(kb, (h_dim,), minval=-bound, maxval=bound,
                              dtype=jnp.float32)

    out = jax.block_until_ready(phi_z_forward(z, weight, bias))
    ref = _reference(z, weight, bias)
    assert out.shape == (B, h_dim)
    assert jnp.allclose(out, ref, atol=1e-5, rtol=1e-5), "mismatch (f32, single tile)"

    # Ragged sizes: exercises masked boundary blocks on BOTH grid axes with no padding.
    B2, h2 = 20, 200
    z2 = jax.random.normal(kz, (B2, z_dim), dtype=jnp.float32)
    w2 = jax.random.uniform(kw, (h2, z_dim), minval=-bound, maxval=bound,
                            dtype=jnp.float32)
    b2 = jax.random.uniform(kb, (h2,), minval=-bound, maxval=bound,
                            dtype=jnp.float32)
    out2 = jax.block_until_ready(phi_z_forward(z2, w2, b2, tm_max=16, tn_max=128))
    ref2 = _reference(z2, w2, b2)
    assert out2.shape == (B2, h2)
    assert jnp.allclose(out2, ref2, atol=1e-5, rtol=1e-5), "mismatch (f32, masked boundary tiles)"

    # bf16 streamed operands (v5e/v6e recommendation) + 3-D leading dims flattened
    # into one GEMM; accumulation and epilogue stay f32.
    z3 = jax.random.normal(kz, (2, 10, z_dim), dtype=jnp.float32)
    out3 = jax.block_until_ready(
        phi_z_forward(z3, weight, bias, compute_dtype=jnp.bfloat16))
    ref3 = _reference(z3, weight, bias)
    assert out3.shape == (2, 10, h_dim)
    assert jnp.allclose(out3, ref3, atol=5e-2, rtol=5e-2), "mismatch (bf16 operands)"

    print("KERNEL_OK")
</pallas_src>

<mosaic_0001>
module attributes {stable_mosaic.version = 11 : i64} {
  func.func @_phi_z_kernel(%arg0: i32, %arg1: i32, %arg2: memref<8x16xf32, #tpu.memory_space<vmem>>, %arg3: memref<16x32xf32, #tpu.memory_space<vmem>>, %arg4: memref<1x32xf32, #tpu.memory_space<vmem>>, %arg5: memref<8x32xf32, #tpu.memory_space<vmem>>) attributes {dimension_semantics = [#tpu.dimension_semantics<parallel>, #tpu.dimension_semantics<parallel>], iteration_bounds = array<i64: 1, 1>, scalar_prefetch = 0 : i64, scratch_operands = 0 : i64, tpu.core_type = #tpu.core_type<tc>, window_params = [{transform_indices = @transform_0, window_bounds = array<i64: 8, 16>}, {transform_indices = @transform_1, window_bounds = array<i64: 16, 32>}, {transform_indices = @transform_2, window_bounds = array<i64: 1, 32>}, {transform_indices = @transform_3, window_bounds = array<i64: 8, 32>}]} {
    %c0 = arith.constant 0 : index
    %c0_0 = arith.constant 0 : index
    %0 = vector.load %arg2[%c0, %c0_0] : memref<8x16xf32, #tpu.memory_space<vmem>>, vector<8x16xf32>
    %c0_1 = arith.constant 0 : index
    %c0_2 = arith.constant 0 : index
    %1 = vector.load %arg3[%c0_1, %c0_2] : memref<16x32xf32, #tpu.memory_space<vmem>>, vector<16x32xf32>
    %cst = arith.constant dense<0.000000e+00> : vector<8x32xf32>
    %2 = tpu.matmul %0, %1, %cst {dimension_numbers = #tpu.dot_dimension_numbers<[1], [0], [0], [1], [0, 0, 1, 1], [], []>} : vector<8x16xf32>, vector<16x32xf32>, vector<8x32xf32> -> vector<8x32xf32>
    %c0_3 = arith.constant 0 : index
    %c0_4 = arith.constant 0 : index
    %3 = vector.load %arg4[%c0_3, %c0_4] : memref<1x32xf32, #tpu.memory_space<vmem>>, vector<1x32xf32>
    %4 = vector.broadcast %3 : vector<1x32xf32> to vector<8x32xf32>
    %5 = arith.addf %2, %4 : vector<8x32xf32>
    %cst_5 = arith.constant 0.000000e+00 : f32
    %6 = vector.broadcast %cst_5 : f32 to vector<8x32xf32>
    %7 = arith.maximumf %5, %6 : vector<8x32xf32>
    %c0_6 = arith.constant 0 : index
    %c0_7 = arith.constant 0 : index
    %8 = vector.load %arg5[%c0_6, %c0_7] : memref<8x32xf32, #tpu.memory_space<vmem>>, vector<8x32xf32>
    tpu.vector_store %arg5[%c0_6, %c0_7], %7 {strides = array<i32>} : memref<8x32xf32, #tpu.memory_space<vmem>>, vector<8x32xf32>,
    return
  }
  func.func @transform_0(%arg0: i32, %arg1: i32) -> (i32, i32) {
    %c0_i32 = arith.constant 0 : i32
    %c0_i32_0 = arith.constant 0 : i32
    return %arg0, %c0_i32 : i32, i32
  }
  func.func @transform_1(%arg0: i32, %arg1: i32) -> (i32, i32) {
    %c0_i32 = arith.constant 0 : i32
    %c0_i32_0 = arith.constant 0 : i32
    return %c0_i32, %arg1 : i32, i32
  }
  func.func @transform_2(%arg0: i32, %arg1: i32) -> (i32, i32) {
    %c0_i32 = arith.constant 0 : i32
    %c0_i32_0 = arith.constant 0 : i32
    return %c0_i32, %arg1 : i32, i32
  }
  func.func @transform_3(%arg0: i32, %arg1: i32) -> (i32, i32) {
    %c0_i32 = arith.constant 0 : i32
    return %arg0, %arg1 : i32, i32
  }
}

</mosaic_0001>

<bundles_post_ra>
// kernel: tpu_custom_call.1
= control target key start
LH: loop header
LB: loop body
LE: loop exit
PB: predicated region body
PF: predicated region fallthrough
CT: control target
= control target key end

     0   :  { %8 = vsyncpa [#allocation3], 0  ;;  %s313_s0 = inlined_call_operand.hbm [shape: f32[8,16], index: 0, kind: input, shape index: {}]   ;;  %s314_s1 = inlined_call_operand.hbm [shape: f32[16,32], index: 1, kind: input, shape index: {}]   ;;  %s315_s2 = inlined_call_operand.vmem [shape: f32[1,32], index: 2, kind: input, shape index: {}]   ;;  %s316_s3 = inlined_call_operand.hbm [shape: f32[8,32], index: 3, kind: output, shape index: {}]  }
   0x1   :  { %9 = vsyncpa [#allocation6], 0 }
   0x2   :  { %10 = vsyncpa [#allocation4], 0  ;;  %s239_s12 = smov [#allocation2]   ;;  %s240_s14 = smov [#allocation5]  }
   0x3   :  { %s17_s13 = sshll.u32 %s239_s12, 4  ;;  %s26_s15 = sshll.u32 %s240_s14, 4  ;;  %s18_s13 = int_to_ptr.vmem [resolvable:$true] %s17_s13  ;;  %s267_s15 = int_to_ptr.vmem [resolvable:$true] %s26_s15 }
   0x4   :  { %s167_s18 = scalar_lea.hbm %s313_s0, 128 }
   0x5   :  { %p168_p0 = scmp.ne.s32.totalorder %s313_s0, %s167_s18  ;;  %p171_p1 = scmp.lt.u32.totalorder %s167_s18, %s313_s0 }
   0x7   :  { %p173_p2 = pnand %p171_p1, %p168_p0 }
   0x9   :  { %176 = shalt.err (!%p173_p2)
}
   0xa   :  { %s177_s23 = scalar_lea.vmem %s18_s13, 128  ;;  %p182_p4 = scmp.lt.s32.totalorder %s18_s13, %s18_s13 }
   0xb   :  { %p178_p3 = scmp.ne.s32.totalorder %s18_s13, %s177_s23  ;;  %p183_p5 = scmp.lt.s32.totalorder %s177_s23, %s177_s23 }
   0xd   :  { %p184_p6 = por %p183_p5, %p182_p4 }
   0xf   :  { %p185_p7 = pnand %p184_p6, %p178_p3 }
  0x11   :  { %188 = shalt.err (!%p185_p7)
}
  0x12   :  { %20 = dma.hbm_to_vmem [thread:$0]  %s313_s0, 128, %s18_s13, [#allocation3]  }
  0x13   :  { %s189_s28 = scalar_lea.hbm %s314_s1, 256 }
  0x14   :  { %p190_p8 = scmp.ne.s32.totalorder %s314_s1, %s189_s28  ;;  %p193_p9 = scmp.lt.u32.totalorder %s189_s28, %s314_s1 }
  0x16   :  { %p195_p10 = pnand %p193_p9, %p190_p8 }
  0x18   :  { %198 = shalt.err (!%p195_p10)
}
  0x19   :  { %s199_s6 = scalar_lea.vmem %s267_s15, 256  ;;  %p204_p12 = scmp.lt.s32.totalorder %s267_s15, %s267_s15 }
  0x1a   :  { %p200_p11 = scmp.ne.s32.totalorder %s267_s15, %s199_s6  ;;  %p205_p13 = scmp.lt.s32.totalorder %s199_s6, %s199_s6 }
  0x1c   :  { %p206_p0 = por %p205_p13, %p204_p12 }
  0x1e   :  { %p207_p1 = pnand %p206_p0, %p200_p11 }
  0x20   :  { %210 = shalt.err (!%p207_p1)
}
  0x21   :  { %s241_s0 = smov 128   ;;  %s242_s7 = smov 8  }
  0x22   :  { %32 = dma.hbm_to_vmem [thread:$0]  %s314_s1, 256, %s267_s15, [#allocation6], %s241_s0, %s241_s0, %s242_s7  }
  0x23   :  { %233 = dma.done.wait [#allocation3], 128  }
  0x24   :  { %234 = vsyncadd [#allocation3], 4294967168 }
  0x25   :  { %235 = dma.done.wait [#allocation6], 256  }
  0x26   :  { %236 = vsyncadd [#allocation6], 4294967040  ;;  %v243_v0 = vmov 0.0|0.0   ;;  %vm244_vm0 = vmmov 0   ;;  %v245_v1 = vmov 0.0   ;;  %v42_v2 = vld [vmem:[#allocation5] sm:$0xff] }
  0x27   :  { %156 = vmatprep.subr.bf16.mxu0 %v243_v0  ;;  %153 = vmatprep.mubr.msk.f32.mxu0 %vm244_vm0, %v245_v1  ;;  %v43_v3 = vld [vmem:[#allocation5 + $0x8] sm:$0xff]  ;;  %v41_v5 = vld [vmem:[#allocation2] sm:$0xff]  ;;  %vm51_vm1 = vcmask 130048   ;;  %s246_s1 = smov [#allocation7]   ;;  %vm126_vm2 = vcmask 261120  }
  0x28   :  { %v157_v4 = vpack.c.bf16 %v43_v3, %v42_v2  ;;  %v144_v6 = vld [vmem:[%s315_s2] ss:$0 sm:$0xff]  ;;  %s134_s12 = sshll.u32 %s246_s1, 4  ;;  %s135_s12 = int_to_ptr.vmem [resolvable:$true] %s134_s12 }
  0x29   :  { %s211_s13 = scalar_lea.vmem %s135_s12, 128  ;;  %p216_p3 = scmp.lt.s32.totalorder %s135_s12, %s135_s12 }
  0x2a   :  { %158 = vmatpush3.bf16.msra.mxu0 %v157_v4  ;;  %p212_p2 = scmp.ne.s32.totalorder %s135_s12, %s211_s13  ;;  %p217_p4 = scmp.lt.s32.totalorder %s211_s13, %s211_s13 }
  0x2c   :  { %p218_p5 = por %p217_p4, %p216_p3 }
  0x2d   :  { %154 = vmatmul.mubr.msk.f32.vlgmr.msra.gmra.mrb[0].mxu0 %vm51_vm1, %v41_v5 }
  0x2e   :  { %p219_p6 = pnand %p218_p5, %p212_p2 }
 0x100   :  { %v121_v7 = vpop.f32.mrb[0].mxu0 }
 0x101   :  { %v122_v8 = vadd.f32 %v144_v6, %v121_v7  ;;  %v155_v9 = vpop.f32.mrb[1].mxu0 }
 0x103   :  { %v125_v10 = vmax.f32 %v122_v8, 0.0 }
 0x105   :  { %127 = vst.msk [vmem:[#allocation7] sm:$0xff] %vm126_vm2, %v125_v10 }
 0x106   :  { %222 = shalt.err (!%p219_p6)
}
 0x107   :  { %s223_s2 = scalar_lea.hbm %s316_s3, 128 }
 0x108   :  { %p224_p7 = scmp.ne.s32.totalorder %s316_s3, %s223_s2  ;;  %p227_p8 = scmp.lt.u32.totalorder %s223_s2, %s316_s3 }
 0x10a   :  { %p229_p9 = pnand %p227_p8, %p224_p7 }
 0x10c   :  { %232 = shalt.err (!%p229_p9)
}
 0x10d   :  { %137 = dma.vmem_to_hbm [thread:$0]  %s135_s12, 128, %s316_s3, [#allocation4]  }
 0x10e   :  { %237 = dma.done.wait [#allocation4], 128  }
 0x10f   :  { %238 = vsyncadd [#allocation4], 4294967168 }
 0x110   :  { %141 = vsyncpa [#allocation3], 1 }
 0x111   :  { %142 = vsyncpa [#allocation6], 1 }
 0x112   :  { %143 = vsyncpa [#allocation4], 1 }

</bundles_post_ra>
